<compile_context>
chip_gen: v7x
topology: tpu7x:2x2x1
jax: 0.10.0
libtpu: 0.0.40
codegen_flags: <defaults>
</compile_context>

<pallas_src>
import jax
import jax.numpy as jnp
from jax.experimental import pallas as pl
from jax.experimental.pallas import tpu as pltpu

_TARGET_TILE_BYTES = 4 << 20  # ~4 MiB per streamed operand tile


def _dc_kernel(w_ref, mask_ref, pred_ref, ref_ref, out_ref):
    """out = ((1 - m) * pred + m * ref) * w   (pure VPU, no reductions)."""
    w = w_ref[0]            # SMEM f32 scalar
    m = mask_ref[...]       # (1, 1, L) resident  or  (1, T, L) streamed
    p = pred_ref[...]       # (1, T, L)
    r = ref_ref[...]        # (1, T, L)
    out_ref[...] = (((1.0 - m) * p + m * r) * w).astype(out_ref.dtype)


def _tpu_generation():
    """Return (physical VMEM bytes per TensorCore, chip has two TensorCores)."""
    vmem = 128 << 20  # v5e / v6e
    two_tc = False
    kind = ""
    try:
        kind = (jax.devices()[0].device_kind or "").lower()
    except Exception:
        pass
    if "v7" in kind or "tpu7" in kind:
        vmem = 64 << 20
        two_tc = True
    try:  # prefer the real number when the query API is available
        info = pltpu.get_tpu_info()
        cap = getattr(info, "vmem_capacity_bytes", None)
        if cap:
            vmem = int(cap)
    except Exception:
        pass
    return vmem, two_tc


def _prefix_split(mask_lead, lead_dims):
    """Smallest p s.t. mask leading dims == data dims for [:p] and == 1 after."""
    n = len(lead_dims)
    for p in range(n + 1):
        if all(mask_lead[i] == lead_dims[i] for i in range(p)) and all(
            mask_lead[i] == 1 for i in range(p, n)
        ):
            return p
    return None


def data_consistency(pred_kspace, ref_kspace, mask, dc_weight):
    """Pallas implementation of VSNet DataConsistencyLayer.forward."""
    pred = jnp.asarray(pred_kspace)
    ref = jnp.asarray(ref_kspace)
    mask = jnp.asarray(mask)
    assert pred.shape == ref.shape, "pred/ref k-space shapes must match"
    assert pred.ndim >= 3, "expect (..., H, W, 2) k-space"

    dtype = pred.dtype
    if ref.dtype != dtype:
        ref = ref.astype(dtype)

    # Drop redundant size-1 leading mask dims, then right-align with data dims.
    while mask.ndim > pred.ndim and mask.shape[0] == 1:
        mask = mask.reshape(mask.shape[1:])
    assert jnp.broadcast_shapes(mask.shape, pred.shape) == pred.shape, (
        "mask must broadcast to the k-space shape")

    shape = pred.shape
    H, W, C2 = int(shape[-3]), int(shape[-2]), int(shape[-1])
    feat = H * W * C2                              # lane-dense feature axis
    lead_dims = tuple(int(d) for d in shape[:-3])
    n_lead = 1
    for d in lead_dims:
        n_lead *= d
    n_lead = max(n_lead, 1)

    mshape = (1,) * (pred.ndim - mask.ndim) + tuple(int(d) for d in mask.shape)
    mask_lead = mshape[: len(lead_dims)]
    split_p = _prefix_split(mask_lead, lead_dims)

    if split_p is not None:
        mask_lead_size = 1
        for d in lead_dims[:split_p]:
            mask_lead_size *= d
        mask_lead_size = max(mask_lead_size, 1)
        group = max(1, n_lead // mask_lead_size)
        target = lead_dims[:split_p] + (1,) * (len(lead_dims) - split_p) + (H, W, C2)
        mask3 = (jnp.broadcast_to(mask.reshape(mshape), target)
                 .astype(dtype).reshape(mask_lead_size, 1, feat))
    else:
        # TODO(synk): mask varies over the leading dims in a non-prefix pattern;
        # fall back to streaming a fully-broadcast mask (4N instead of 3N traffic).
        mask_lead_size, group = 1, n_lead
        mask3 = (jnp.broadcast_to(mask.reshape(mshape), shape)
                 .astype(dtype).reshape(1, n_lead, feat))

    # Free (contiguous) reshapes of the streamed operands.
    pred3 = pred.reshape(mask_lead_size, group, feat)
    ref3 = ref.reshape(mask_lead_size, group, feat)

    # ---------- generation-aware tile sizing ----------
    itemsize = dtype.itemsize
    vmem_phys, two_tc = _tpu_generation()
    # 3 streamed operands x 2 pipeline buffers must fit within ~half of VMEM.
    op_cap = max(1 << 20, min(8 << 20, (vmem_phys // 2) // 6))
    per_tile_target = min(_TARGET_TILE_BYTES, op_cap)

    sub = 8 if itemsize >= 4 else (32 // itemsize)   # sublane pack: f32=8, bf16=16
    full_row_bytes = feat * itemsize
    if full_row_bytes * sub > per_tile_target and feat > 128:
        # Huge rows (big H*W): tile the lane axis in multiples of 128 so `sub`
        # rows of one lane-tile fit the per-operand budget (v5e/v7x safety).
        lanes = max(128, ((per_tile_target // (sub * itemsize)) // 128) * 128)
        lane_tile = min(feat, int(lanes))
    else:
        lane_tile = feat
    rows_target = max(1, per_tile_target // (lane_tile * itemsize))
    if rows_target >= group:
        tile_g = group
    else:
        tile_g = min(group, max(sub, (rows_target // sub) * sub))

    g_blocks = pl.cdiv(group, tile_g)
    lane_blocks = pl.cdiv(feat, lane_tile)

    # v7x has 2 TensorCores: ensure at least 2 (balanced) grid steps.  Single-TC
    # chips (v5e/v6e) keep the biggest possible single step (no forced split).
    if two_tc and mask_lead_size * g_blocks * lane_blocks < 2:
        if group >= 2 * sub:
            tile_g = ((pl.cdiv(group, 2) + sub - 1) // sub) * sub
        elif feat >= 256:
            lane_tile = max(128, ((feat // 2 + 127) // 128) * 128)
        g_blocks = pl.cdiv(group, tile_g)
        lane_blocks = pl.cdiv(feat, lane_tile)

    grid = (mask_lead_size, g_blocks, lane_blocks)
    data_spec = pl.BlockSpec((1, tile_g, lane_tile), lambda b, g, j: (b, g, j))
    if split_p is not None:
        # One small mask row per leading group; constant along g -> VMEM-resident.
        mask_spec = pl.BlockSpec((1, 1, lane_tile), lambda b, g, j: (b, 0, j))
    else:
        mask_spec = pl.BlockSpec((1, tile_g, lane_tile), lambda b, g, j: (b, g, j))

    # Raise scoped VMEM to cover the double-buffered working set (v5e default is
    # only 16 MiB), capped below physical VMEM (64 MiB on v7x).
    needed = 8 * tile_g * lane_tile * itemsize + (2 << 20)
    vmem_limit = int(min(max(needed, 32 << 20), (vmem_phys * 7) // 8))

    w = jnp.asarray(dc_weight, jnp.float32).reshape(1)

    out3 = pl.pallas_call(
        _dc_kernel,
        out_shape=jax.ShapeDtypeStruct((mask_lead_size, group, feat), dtype),
        grid=grid,
        in_specs=[
            pl.BlockSpec(memory_space=pltpu.MemorySpace.SMEM),  # dc_weight scalar
            mask_spec,   # small (resident / per-group) mask
            data_spec,   # pred
            data_spec,   # ref
        ],
        out_specs=data_spec,
        compiler_params=pltpu.CompilerParams(
            dimension_semantics=("parallel", "parallel", "parallel"),
            vmem_limit_bytes=vmem_limit,
        ),
    )(w, mask3, pred3, ref3)

    return out3.reshape(shape)


if __name__ == "__main__":
    key = jax.random.PRNGKey(0)
    k1, k2, k3, k4 = jax.random.split(key, 4)

    # Small shapes consistent with the mridc convention: (batch, coils, H, W, 2).
    B, C, H, W = 2, 4, 16, 16
    pred = jax.random.normal(k1, (B, C, H, W, 2), dtype=jnp.float32)
    ref = jax.random.normal(k2, (B, C, H, W, 2), dtype=jnp.float32)

    # --- Test 1: standard mridc sampling mask, broadcast over batch/coils. ---
    mask = (jax.random.uniform(k3, (1, 1, H, W, 1)) > 0.5).astype(jnp.float32)
    dc_weight = jnp.ones((1,), jnp.float32)  # torch.nn.Parameter(torch.ones(1))
    out = data_consistency(pred, ref, mask, dc_weight)
    jax.block_until_ready(out)
    expected = ((1.0 - mask) * pred + mask * ref) * dc_weight
    assert out.shape == pred.shape
    assert jnp.allclose(out, expected, atol=1e-5, rtol=1e-5)

    # --- Test 2: per-batch mask + non-unit dc_weight (grouped-mask path). ---
    mask_b = (jax.random.uniform(k4, (B, 1, H, W, 1)) > 0.5).astype(jnp.float32)
    dc_w2 = jnp.full((1,), 0.5, jnp.float32)
    out2 = data_consistency(pred, ref, mask_b, dc_w2)
    jax.block_until_ready(out2)
    expected2 = ((1.0 - mask_b) * pred + mask_b * ref) * dc_w2
    assert out2.shape == pred.shape
    assert jnp.allclose(out2, expected2, atol=1e-5, rtol=1e-5)

    print("KERNEL_OK")
</pallas_src>

<mosaic_0001>
module attributes {stable_mosaic.version = 11 : i64} {
  func.func @_dc_kernel(%arg0: i32, %arg1: i32, %arg2: i32, %arg3: memref<1xf32, #tpu.memory_space<smem>>, %arg4: memref<1x1x512xf32, #tpu.memory_space<vmem>>, %arg5: memref<1x8x512xf32, #tpu.memory_space<vmem>>, %arg6: memref<1x8x512xf32, #tpu.memory_space<vmem>>, %arg7: memref<1x8x512xf32, #tpu.memory_space<vmem>>) attributes {dimension_semantics = [#tpu.dimension_semantics<parallel>, #tpu.dimension_semantics<parallel>, #tpu.dimension_semantics<parallel>], iteration_bounds = array<i64: 1, 1, 1>, scalar_prefetch = 0 : i64, scratch_operands = 0 : i64, tpu.core_type = #tpu.core_type<tc>, window_params = [{transform_indices = @transform_0, window_bounds = array<i64: 1>}, {transform_indices = @transform_1, window_bounds = array<i64: 1, 1, 512>}, {transform_indices = @transform_2, window_bounds = array<i64: 1, 8, 512>}, {transform_indices = @transform_3, window_bounds = array<i64: 1, 8, 512>}, {transform_indices = @transform_4, window_bounds = array<i64: 1, 8, 512>}]} {
    %c0 = arith.constant 0 : index
    %0 = memref.load %arg3[%c0] : memref<1xf32, #tpu.memory_space<smem>>
    %c0_0 = arith.constant 0 : index
    %c0_1 = arith.constant 0 : index
    %c0_2 = arith.constant 0 : index
    %1 = vector.load %arg4[%c0_0, %c0_1, %c0_2] : memref<1x1x512xf32, #tpu.memory_space<vmem>>, vector<1x1x512xf32>
    %c0_3 = arith.constant 0 : index
    %c0_4 = arith.constant 0 : index
    %c0_5 = arith.constant 0 : index
    %2 = vector.load %arg5[%c0_3, %c0_4, %c0_5] : memref<1x8x512xf32, #tpu.memory_space<vmem>>, vector<1x8x512xf32>
    %c0_6 = arith.constant 0 : index
    %c0_7 = arith.constant 0 : index
    %c0_8 = arith.constant 0 : index
    %3 = vector.load %arg6[%c0_6, %c0_7, %c0_8] : memref<1x8x512xf32, #tpu.memory_space<vmem>>, vector<1x8x512xf32>
    %cst = arith.constant 1.000000e+00 : f32
    %4 = vector.broadcast %cst : f32 to vector<1x1x512xf32>
    %5 = arith.subf %4, %1 : vector<1x1x512xf32>
    %6 = vector.broadcast %5 : vector<1x1x512xf32> to vector<1x8x512xf32>
    %7 = arith.mulf %6, %2 : vector<1x8x512xf32>
    %8 = vector.broadcast %1 : vector<1x1x512xf32> to vector<1x8x512xf32>
    %9 = arith.mulf %8, %3 : vector<1x8x512xf32>
    %10 = arith.addf %7, %9 : vector<1x8x512xf32>
    %11 = vector.broadcast %0 : f32 to vector<1x8x512xf32>
    %12 = arith.mulf %10, %11 : vector<1x8x512xf32>
    %c0_9 = arith.constant 0 : index
    %c0_10 = arith.constant 0 : index
    %c0_11 = arith.constant 0 : index
    %13 = vector.load %arg7[%c0_9, %c0_10, %c0_11] : memref<1x8x512xf32, #tpu.memory_space<vmem>>, vector<1x8x512xf32>
    tpu.vector_store %arg7[%c0_9, %c0_10, %c0_11], %12 {strides = array<i32>} : memref<1x8x512xf32, #tpu.memory_space<vmem>>, vector<1x8x512xf32>,
    return
  }
  func.func @transform_0(%arg0: i32, %arg1: i32, %arg2: i32) -> i32 {
    %c0_i32 = arith.constant 0 : i32
    %c0_i32_0 = arith.constant 0 : i32
    return %c0_i32 : i32
  }
  func.func @transform_1(%arg0: i32, %arg1: i32, %arg2: i32) -> (i32, i32, i32) {
    %c0_i32 = arith.constant 0 : i32
    %c0_i32_0 = arith.constant 0 : i32
    return %arg0, %c0_i32, %arg2 : i32, i32, i32
  }
  func.func @transform_2(%arg0: i32, %arg1: i32, %arg2: i32) -> (i32, i32, i32) {
    %c0_i32 = arith.constant 0 : i32
    return %arg0, %arg1, %arg2 : i32, i32, i32
  }
  func.func @transform_3(%arg0: i32, %arg1: i32, %arg2: i32) -> (i32, i32, i32) {
    %c0_i32 = arith.constant 0 : i32
    return %arg0, %arg1, %arg2 : i32, i32, i32
  }
  func.func @transform_4(%arg0: i32, %arg1: i32, %arg2: i32) -> (i32, i32, i32) {
    %c0_i32 = arith.constant 0 : i32
    return %arg0, %arg1, %arg2 : i32, i32, i32
  }
}

</mosaic_0001>

<bundles_post_ra>
// kernel: tpu_custom_call.1
= control target key start
LH: loop header
LB: loop body
LE: loop exit
PB: predicated region body
PF: predicated region fallthrough
CT: control target
= control target key end

     0   :  { %10 = vsyncpa [#allocation4], 0  ;;  %s322_s0 = inlined_call_operand.<no memory space> [shape: f32[1], index: 0, kind: input, shape index: {}]   ;;  %s323_s1 = inlined_call_operand.hbm [shape: f32[1,1,512], index: 1, kind: input, shape index: {}]   ;;  %s324_s2 = inlined_call_operand.hbm [shape: f32[1,8,512], index: 2, kind: input, shape index: {}]   ;;  %s325_s3 = inlined_call_operand.hbm [shape: f32[1,8,512], index: 3, kind: input, shape index: {}]   ;;  %s326_s4 = inlined_call_operand.hbm [shape: f32[1,8,512], index: 4, kind: output, shape index: {}]  }
   0x1   :  { %11 = vsyncpa [#allocation7], 0 }
   0x2   :  { %12 = vsyncpa [#allocation5], 0  ;;  %s242_s15 = smov [#allocation6]   ;;  %s243_s17 = smov [#allocation3]  }
   0x3   :  { %s31_s16 = sshll.u32 %s242_s15, 4  ;;  %s21_s18 = sshll.u32 %s243_s17, 4  ;;  %s32_s16 = int_to_ptr.vmem [resolvable:$true] %s31_s16  ;;  %s22_s18 = int_to_ptr.vmem [resolvable:$true] %s21_s18 }
   0x4   :  { %s148_s21 = scalar_lea.hbm %s324_s2, 512 }
   0x5   :  { %p149_p0 = scmp.ne.s32.totalorder %s324_s2, %s148_s21  ;;  %p152_p1 = scmp.lt.u32.totalorder %s148_s21, %s324_s2 }
   0x7   :  { %p154_p2 = pnand %p152_p1, %p149_p0 }
   0x9   :  { %157 = shalt.err (!%p154_p2)
}
   0xa   :  { %s158_s26 = scalar_lea.vmem %s32_s16, 512  ;;  %p163_p4 = scmp.lt.s32.totalorder %s32_s16, %s32_s16 }
   0xb   :  { %p159_p3 = scmp.ne.s32.totalorder %s32_s16, %s158_s26  ;;  %p164_p5 = scmp.lt.s32.totalorder %s158_s26, %s158_s26 }
   0xd   :  { %p165_p6 = por %p164_p5, %p163_p4 }
   0xf   :  { %p166_p7 = pnand %p165_p6, %p159_p3 }
  0x11   :  { %169 = shalt.err (!%p166_p7)
}
  0x12   :  { %34 = dma.hbm_to_vmem [thread:$0]  %s324_s2, 512, %s32_s16, [#allocation7]  }
  0x13   :  { %s170_s5 = scalar_lea.hbm %s323_s1, 64 }
  0x14   :  { %p171_p8 = scmp.ne.s32.totalorder %s323_s1, %s170_s5  ;;  %p174_p9 = scmp.lt.u32.totalorder %s170_s5, %s323_s1 }
  0x16   :  { %p176_p10 = pnand %p174_p9, %p171_p8 }
  0x18   :  { %179 = shalt.err (!%p176_p10)
}
  0x19   :  { %s180_s10 = scalar_lea.vmem %s22_s18, 64  ;;  %p185_p12 = scmp.lt.s32.totalorder %s22_s18, %s22_s18 }
  0x1a   :  { %p181_p11 = scmp.ne.s32.totalorder %s22_s18, %s180_s10  ;;  %p186_p13 = scmp.lt.s32.totalorder %s180_s10, %s180_s10 }
  0x1c   :  { %p187_p0 = por %p186_p13, %p185_p12 }
  0x1e   :  { %p188_p1 = pnand %p187_p0, %p181_p11 }
  0x20   :  { %191 = shalt.err (!%p188_p1)
}
  0x21   :  { %24 = dma.hbm_to_vmem [thread:$0]  %s323_s1, 64, %s22_s18, [#allocation4]  }
  0x22   :  { %s244_s12 = smov [#allocation8]   ;;  %s192_s16 = scalar_lea.hbm %s325_s3, 512 }
  0x23   :  { %s41_s13 = sshll.u32 %s244_s12, 4  ;;  %p193_p2 = scmp.ne.s32.totalorder %s325_s3, %s192_s16  ;;  %s42_s13 = int_to_ptr.vmem [resolvable:$true] %s41_s13 }
  0x24   :  { %p196_p3 = scmp.lt.u32.totalorder %s192_s16, %s325_s3 }
  0x26   :  { %p198_p4 = pnand %p196_p3, %p193_p2 }
  0x28   :  { %201 = shalt.err (!%p198_p4)
}
  0x29   :  { %s202_s22 = scalar_lea.vmem %s42_s13, 512  ;;  %p207_p6 = scmp.lt.s32.totalorder %s42_s13, %s42_s13 }
  0x2a   :  { %p203_p5 = scmp.ne.s32.totalorder %s42_s13, %s202_s22  ;;  %p208_p7 = scmp.lt.s32.totalorder %s202_s22, %s202_s22 }
  0x2c   :  { %p209_p8 = por %p208_p7, %p207_p6 }
  0x2e   :  { %p210_p9 = pnand %p209_p8, %p203_p5 }
  0x30   :  { %213 = shalt.err (!%p210_p9)
}
  0x31   :  { %44 = dma.hbm_to_vmem [thread:$0]  %s325_s3, 512, %s42_s13, [#allocation7]  }
  0x32   :  { %236 = dma.done.wait [#allocation4], 64  }
  0x33   :  { %237 = vsyncadd [#allocation4], 4294967232 }
  0x34   :  { %238 = dma.done.wait [#allocation7], 1024  }
  0x35   :  { %239 = vsyncadd [#allocation7], 4294966272  ;;  %v66_v0 = vlaneseq  ;;  %v55_v6 = vld [vmem:[#allocation3] sm:$0xf]  ;;  %v60_v7 = vld [vmem:[#allocation8] sm:$0xff]  ;;  %v119_v30 = vstv %s322_s0  ;;  %s245_s24 = smov [#allocation9]  }
  0x36   :  { %v56_v8 = vld [vmem:[#allocation6] sm:$0xff]  ;;  %v64_v9 = vsub.f32 1.0, %v55_v6  ;;  %v61_v11 = vld [vmem:[#allocation8 + $0x8] sm:$0xff]  ;;  %v62_v15 = vld [vmem:[#allocation8 + $0x10] sm:$0xff]  ;;  %s134_s25 = sshll.u32 %s245_s24, 4  ;;  %s135_s25 = int_to_ptr.vmem [resolvable:$true] %s134_s25 }
  0x37   :  { %v67_v1 = vshrl.u32 %v66_v0, 7  ;;  %v57_v14 = vld [vmem:[#allocation6 + $0x8] sm:$0xff]  ;;  %v63_v16 = vld [vmem:[#allocation8 + $0x18] sm:$0xff]  ;;  %v58_v22 = vld [vmem:[#allocation6 + $0x10] sm:$0xff]  ;;  %s214_s26 = scalar_lea.vmem %s135_s25, 512  ;;  %p219_p11 = scmp.lt.s32.totalorder %s135_s25, %s135_s25 }
  0x38   :  { %v59_v23 = vld [vmem:[#allocation6 + $0x18] sm:$0xff]  ;;  %p215_p10 = scmp.ne.s32.totalorder %s135_s25, %s214_s26  ;;  %p220_p12 = scmp.lt.s32.totalorder %s214_s26, %s214_s26 }
  0x39   :  { %v68_v2 = vsub.s32 0, %v67_v1  ;;  %v72_v3 = vsub.s32 1, %v67_v1  ;;  %v76_v4 = vsub.s32 2, %v67_v1  ;;  %v80_v5 = vsub.s32 3, %v67_v1 }
  0x3a   :  { %p221_p13 = por %p220_p12, %p219_p11 }
  0x3b   :  { %v94_v10 = vrot.slane %v55_v6, %v68_v2  ;;  %v98_v12 = vrot.slane %v55_v6, %v72_v3  ;;  %v102_v13 = vrot.slane %v55_v6, %v76_v4  ;;  %v106_v17 = vrot.slane %v55_v6, %v80_v5 }
  0x3c   :  { %v69_v18 = vrot.slane %v64_v9, %v68_v2  ;;  %v73_v20 = vrot.slane %v64_v9, %v72_v3  ;;  %v77_v24 = vrot.slane %v64_v9, %v76_v4  ;;  %v81_v26 = vrot.slane %v64_v9, %v80_v5  ;;  %p222_p0 = pnand %p221_p13, %p215_p10 }
  0x3d   :  { %v111_v19 = vmul.f32 %v94_v10, %v60_v7  ;;  %v112_v21 = vmul.f32 %v98_v12, %v61_v11  ;;  %v113_v25 = vmul.f32 %v102_v13, %v62_v15  ;;  %v114_v27 = vmul.f32 %v106_v17, %v63_v16 }
  0x3e   :  { %v86_v28 = vmul.f32 %v69_v18, %v56_v8  ;;  %v87_v29 = vmul.f32 %v73_v20, %v57_v14  ;;  %v88_v31 = vmul.f32 %v77_v24, %v58_v22  ;;  %v89_v32 = vmul.f32 %v81_v26, %v59_v23 }
  0x40   :  { %v115_v33 = vadd.f32 %v111_v19, %v86_v28  ;;  %v116_v34 = vadd.f32 %v112_v21, %v87_v29  ;;  %v117_v35 = vadd.f32 %v113_v25, %v88_v31  ;;  %v118_v36 = vadd.f32 %v114_v27, %v89_v32 }
  0x42   :  { %v120_v37 = vmul.f32 %v119_v30, %v115_v33  ;;  %v121_v38 = vmul.f32 %v119_v30, %v116_v34  ;;  %v122_v39 = vmul.f32 %v119_v30, %v117_v35  ;;  %v123_v40 = vmul.f32 %v119_v30, %v118_v36 }
  0x44   :  { %124 = vst [vmem:[#allocation9] sm:$0xff] %v120_v37  ;;  %125 = vst [vmem:[#allocation9 + $0x8] sm:$0xff] %v121_v38 }
  0x45   :  { %126 = vst [vmem:[#allocation9 + $0x10] sm:$0xff] %v122_v39  ;;  %127 = vst [vmem:[#allocation9 + $0x18] sm:$0xff] %v123_v40 }
  0x46   :  { %225 = shalt.err (!%p222_p0)
}
  0x47   :  { %s226_s28 = scalar_lea.hbm %s326_s4, 512 }
  0x48   :  { %p227_p1 = scmp.ne.s32.totalorder %s326_s4, %s226_s28  ;;  %p230_p2 = scmp.lt.u32.totalorder %s226_s28, %s326_s4 }
  0x4a   :  { %p232_p3 = pnand %p230_p2, %p227_p1 }
  0x4c   :  { %235 = shalt.err (!%p232_p3)
}
  0x4d   :  { %137 = dma.vmem_to_hbm [thread:$0]  %s135_s25, 512, %s326_s4, [#allocation5]  }
  0x4e   :  { %240 = dma.done.wait [#allocation5], 512  }
  0x4f   :  { %241 = vsyncadd [#allocation5], 4294966784 }
  0x50   :  { %141 = vsyncpa [#allocation4], 1 }
  0x51   :  { %142 = vsyncpa [#allocation7], 1 }
  0x52   :  { %143 = vsyncpa [#allocation5], 1 }

</bundles_post_ra>
